<compile_context>
chip_gen: v7x
topology: tpu7x:2x2x1
jax: 0.10.0
libtpu: 0.0.40
codegen_flags: <defaults>
</compile_context>

<pallas_src>
import functools

import jax
import jax.numpy as jnp
from jax.experimental import pallas as pl
from jax.experimental.pallas import tpu as pltpu

_SUBLANE = 8    # second-to-last dim alignment
_LANE = 128     # last dim alignment


def _round_up(x, m):
    return (x + m - 1) // m * m


def _pick_time_chunk(seq_len, cap=4):
    """Largest divisor of seq_len not exceeding `cap` (static unroll bound)."""
    for c in range(min(seq_len, cap), 0, -1):
        if seq_len % c == 0:
            return c
    return 1


def _lstm_chunk_kernel(x_ref, wx_ref, wh_ref, b_ref, h0_ref, c0_ref,
                       out_ref, hn_ref, cn_ref, h_scr, c_scr,
                       *, chunk, nb, h_in, h_pad):
    """One (batch-block, time-chunk) grid step.

    x_ref  : (chunk, nb, h_in)      time-major input chunk
    wx_ref : (h_in, 4*h_pad)        fused, lane-aligned input weights [i|f|g|o]
    wh_ref : (h_pad, 4*h_pad)       fused, lane-aligned hidden weights
    b_ref  : (1, 4*h_pad)           fused bias (b_x + b_h)
    out_ref: (chunk, nb, h_pad)     per-step hidden states for this chunk
    hn/cn  : (nb, h_pad)            final state (revisited across time chunks)
    h_scr/c_scr : VMEM (nb, h_pad) f32 recurrence carry, persists across grid
    """
    t = pl.program_id(1)

    @pl.when(t == 0)
    def _():
        h_scr[...] = h0_ref[...].astype(jnp.float32)
        c_scr[...] = c0_ref[...].astype(jnp.float32)

    # Hoisted per-chunk input projection: ONE (chunk*nb, h_in) @ (h_in, 4*h_pad)
    # MXU matmul with the bias folded in.  Off the serial critical path.
    xflat = x_ref[...].reshape(chunk * nb, h_in)
    xw = (jnp.dot(xflat, wx_ref[...], preferred_element_type=jnp.float32)
          + b_ref[...])                                   # (chunk*nb, 4*h_pad)

    wh = wh_ref[...]
    h = h_scr[...]
    c = c_scr[...]

    # Serial recurrence: only the fused h @ W_h matmul + gate math per step is
    # on the critical path.  chunk <= 4 keeps the static unroll small.
    # TODO(synk): at large hidden sizes hold W_h in MXU weight regs across the
    # loop via pltpu.matmul_push_rhs / matmul_acc_lhs / matmul_pop.
    for tt in range(chunk):
        pre = xw[tt * nb:(tt + 1) * nb, :] + jnp.dot(
            h, wh, preferred_element_type=jnp.float32)    # (nb, 4*h_pad)

        # h_pad is a multiple of 128 -> every gate slice is vreg-lane-aligned.
        gate_in = jax.nn.sigmoid(pre[:, 0 * h_pad:1 * h_pad])
        gate_forget = jax.nn.sigmoid(pre[:, 1 * h_pad:2 * h_pad])
        gate_cell = jnp.tanh(pre[:, 2 * h_pad:3 * h_pad])
        gate_out = jax.nn.sigmoid(pre[:, 3 * h_pad:4 * h_pad])

        c = gate_forget * c + gate_in * gate_cell
        h = gate_out * jnp.tanh(c)

        out_ref[tt] = h.astype(out_ref.dtype)             # (8,128)-dense store

    h_scr[...] = h
    c_scr[...] = c
    hn_ref[...] = h.astype(hn_ref.dtype)
    cn_ref[...] = c.astype(cn_ref.dtype)


@jax.jit
def lstm_layer_forward(inputs, h0, c0, wx_g, wh_g, b_g):
    """inputs: (N, L, H_in); h0/c0: (N, H_out).

    wx_g: (4, H_in, H_out), wh_g: (4, H_out, H_out), b_g: (4, 1, H_out)
    per-gate parameters in order [i, f, g, o] (b_x + b_h already folded).
    Returns (output (N, L, H_out), (h_n, c_n)) matching LSTMLayer.forward.
    """
    N, L, H_in = inputs.shape
    H_out = h0.shape[-1]
    dtype = inputs.dtype

    # Alignment padding: batch -> sublane multiple, hidden -> lane multiple.
    N_pad = _round_up(max(N, _SUBLANE), _SUBLANE)
    H_pad = _round_up(max(H_out, _LANE), _LANE)
    G = 4 * H_pad

    # Fused, lane-aligned parameters: gate g occupies lanes
    # [g*H_pad, g*H_pad + H_out); padded rows/lanes are zero so padded state
    # lanes stay exactly zero (sigmoid(0)*0 carries, tanh(0)=0 cell input).
    wx_p = jnp.zeros((H_in, G), dtype)
    wh_p = jnp.zeros((H_pad, G), dtype)
    b_p = jnp.zeros((1, G), dtype)
    for g in range(4):
        s = g * H_pad
        wx_p = wx_p.at[:, s:s + H_out].set(wx_g[g].astype(dtype))
        wh_p = wh_p.at[:H_out, s:s + H_out].set(wh_g[g].astype(dtype))
        b_p = b_p.at[:, s:s + H_out].set(b_g[g].astype(dtype))

    # Time-major input, zero-padded batch.
    # TODO(synk): at large L*N*H express the time-major access directly via
    # index_map over the (N, L, H_in) layout to avoid this extra HBM pass.
    x_tm = jnp.transpose(inputs, (1, 0, 2))                    # (L, N, H_in)
    x_tm = jnp.pad(x_tm, ((0, 0), (0, N_pad - N), (0, 0)))
    h0_p = jnp.pad(h0, ((0, N_pad - N), (0, H_pad - H_out)))
    c0_p = jnp.pad(c0, ((0, N_pad - N), (0, H_pad - H_out)))

    # Grid: (batch blocks [parallel], time chunks [arbitrary]).
    Lc = _pick_time_chunk(L)
    nt = L // Lc
    nb_blocks = 2 if (N_pad >= 16 and N_pad % 16 == 0) else 1  # v7x 2-TC split
    Nb = N_pad // nb_blocks

    kernel = functools.partial(_lstm_chunk_kernel,
                               chunk=Lc, nb=Nb, h_in=H_in, h_pad=H_pad)

    grid_spec = pltpu.PrefetchScalarGridSpec(
        num_scalar_prefetch=0,
        grid=(nb_blocks, nt),
        in_specs=[
            pl.BlockSpec((Lc, Nb, H_in), lambda b, t: (t, b, 0)),   # x chunk
            pl.BlockSpec((H_in, G), lambda b, t: (0, 0)),           # W_x fused
            pl.BlockSpec((H_pad, G), lambda b, t: (0, 0)),          # W_h fused
            pl.BlockSpec((1, G), lambda b, t: (0, 0)),              # bias
            pl.BlockSpec((Nb, H_pad), lambda b, t: (b, 0)),         # h_0
            pl.BlockSpec((Nb, H_pad), lambda b, t: (b, 0)),         # c_0
        ],
        out_specs=[
            pl.BlockSpec((Lc, Nb, H_pad), lambda b, t: (t, b, 0)),  # per-step h
            pl.BlockSpec((Nb, H_pad), lambda b, t: (b, 0)),         # h_n
            pl.BlockSpec((Nb, H_pad), lambda b, t: (b, 0)),         # c_n
        ],
        scratch_shapes=[
            pltpu.VMEM((Nb, H_pad), jnp.float32),                   # h carry
            pltpu.VMEM((Nb, H_pad), jnp.float32),                   # c carry
        ],
    )

    out_tm, h_n, c_n = pl.pallas_call(
        kernel,
        out_shape=(
            jax.ShapeDtypeStruct((L, N_pad, H_pad), dtype),
            jax.ShapeDtypeStruct((N_pad, H_pad), dtype),
            jax.ShapeDtypeStruct((N_pad, H_pad), dtype),
        ),
        grid_spec=grid_spec,
        compiler_params=pltpu.CompilerParams(
            dimension_semantics=("parallel", "arbitrary"),
        ),
    )(x_tm, wx_p, wh_p, b_p, h0_p, c0_p)

    output = jnp.transpose(out_tm[:, :N, :H_out], (1, 0, 2))   # (N, L, H_out)
    return output, (h_n[:N, :H_out], c_n[:N, :H_out])


def _reference_lstm(inputs, h0, c0, wx_g, wh_g, b_g):
    """Pure-JAX reference (lax.scan) using the per-gate parameter layout."""
    x_tm = jnp.transpose(inputs, (1, 0, 2))

    def step(carry, x):
        h, c = carry
        pre = (jnp.einsum("ni,gio->gno", x, wx_g)
               + jnp.einsum("no,goh->gnh", h, wh_g) + b_g)
        i = jax.nn.sigmoid(pre[0])
        f = jax.nn.sigmoid(pre[1])
        g = jnp.tanh(pre[2])
        o = jax.nn.sigmoid(pre[3])
        c_new = f * c + i * g
        h_new = o * jnp.tanh(c_new)
        return (h_new, c_new), h_new

    (h_n, c_n), ys = jax.lax.scan(step, (h0, c0), x_tm)
    return jnp.transpose(ys, (1, 0, 2)), (h_n, c_n)


if __name__ == "__main__":
    batch_size = 4
    input_size = 16
    hidden_size = 32
    seq_len = 8

    key = jax.random.PRNGKey(0)
    k_x, k_h, k_c, k_wx, k_wh, k_b = jax.random.split(key, 6)

    inputs = jax.random.normal(k_x, (batch_size, seq_len, input_size),
                               dtype=jnp.float32)
    h0 = jax.random.normal(k_h, (batch_size, hidden_size), dtype=jnp.float32)
    c0 = jax.random.normal(k_c, (batch_size, hidden_size), dtype=jnp.float32)

    # Deterministic per-gate parameters: 4 gates x {W_x, W_h, b} (b folded).
    bound = 1.0 / jnp.sqrt(hidden_size)
    wx_g = jax.random.uniform(k_wx, (4, input_size, hidden_size),
                              minval=-bound, maxval=bound, dtype=jnp.float32)
    wh_g = jax.random.uniform(k_wh, (4, hidden_size, hidden_size),
                              minval=-bound, maxval=bound, dtype=jnp.float32)
    b_g = jax.random.uniform(k_b, (4, 1, hidden_size),
                             minval=-bound, maxval=bound, dtype=jnp.float32)

    output, (h_n, c_n) = lstm_layer_forward(inputs, h0, c0, wx_g, wh_g, b_g)
    jax.block_until_ready((output, h_n, c_n))

    ref_out, (ref_h, ref_c) = _reference_lstm(inputs, h0, c0, wx_g, wh_g, b_g)
    assert output.shape == (batch_size, seq_len, hidden_size)
    assert h_n.shape == (batch_size, hidden_size)
    assert c_n.shape == (batch_size, hidden_size)
    assert jnp.allclose(output, ref_out, atol=1e-5, rtol=1e-5)
    assert jnp.allclose(h_n, ref_h, atol=1e-5, rtol=1e-5)
    assert jnp.allclose(c_n, ref_c, atol=1e-5, rtol=1e-5)

    print("KERNEL_OK")
</pallas_src>

<mosaic_0001>
module attributes {stable_mosaic.version = 11 : i64} {
  func.func @_lstm_chunk_kernel(%arg0: i32, %arg1: i32, %arg2: memref<4x8x16xf32, #tpu.memory_space<vmem>>, %arg3: memref<16x512xf32, #tpu.memory_space<vmem>>, %arg4: memref<128x512xf32, #tpu.memory_space<vmem>>, %arg5: memref<1x512xf32, #tpu.memory_space<vmem>>, %arg6: memref<8x128xf32, #tpu.memory_space<vmem>>, %arg7: memref<8x128xf32, #tpu.memory_space<vmem>>, %arg8: memref<4x8x128xf32, #tpu.memory_space<vmem>>, %arg9: memref<8x128xf32, #tpu.memory_space<vmem>>, %arg10: memref<8x128xf32, #tpu.memory_space<vmem>>, %arg11: memref<8x128xf32, #tpu.memory_space<vmem>>, %arg12: memref<8x128xf32, #tpu.memory_space<vmem>>) attributes {dimension_semantics = [#tpu.dimension_semantics<parallel>, #tpu.dimension_semantics<arbitrary>], iteration_bounds = array<i64: 1, 2>, scalar_prefetch = 0 : i64, scratch_operands = 2 : i64, tpu.core_type = #tpu.core_type<tc>, window_params = [{transform_indices = @transform_0, window_bounds = array<i64: 4, 8, 16>}, {pipeline_mode = #tpu.pipeline_mode<synchronous>, transform_indices = @transform_1, window_bounds = array<i64: 16, 512>}, {pipeline_mode = #tpu.pipeline_mode<synchronous>, transform_indices = @transform_2, window_bounds = array<i64: 128, 512>}, {pipeline_mode = #tpu.pipeline_mode<synchronous>, transform_indices = @transform_3, window_bounds = array<i64: 1, 512>}, {transform_indices = @transform_4, window_bounds = array<i64: 8, 128>}, {transform_indices = @transform_5, window_bounds = array<i64: 8, 128>}, {transform_indices = @transform_6, window_bounds = array<i64: 4, 8, 128>}, {transform_indices = @transform_7, window_bounds = array<i64: 8, 128>}, {transform_indices = @transform_8, window_bounds = array<i64: 8, 128>}]} {
    %c0_i32 = arith.constant 0 : i32
    %0 = arith.cmpi eq, %arg1, %c0_i32 : i32
    %1 = arith.extui %0 : i1 to i32
    %c0_i32_0 = arith.constant 0 : i32
    %2 = arith.cmpi ne, %1, %c0_i32_0 : i32
    scf.if %2 {
      %c0_46 = arith.constant 0 : index
      %c0_47 = arith.constant 0 : index
      %141 = vector.load %arg6[%c0_46, %c0_47] : memref<8x128xf32, #tpu.memory_space<vmem>>, vector<8x128xf32>
      %c0_48 = arith.constant 0 : index
      %c0_49 = arith.constant 0 : index
      %142 = vector.load %arg11[%c0_48, %c0_49] : memref<8x128xf32, #tpu.memory_space<vmem>>, vector<8x128xf32>
      tpu.vector_store %arg11[%c0_48, %c0_49], %141 {strides = array<i32>} : memref<8x128xf32, #tpu.memory_space<vmem>>, vector<8x128xf32>,
      %c0_50 = arith.constant 0 : index
      %c0_51 = arith.constant 0 : index
      %143 = vector.load %arg7[%c0_50, %c0_51] : memref<8x128xf32, #tpu.memory_space<vmem>>, vector<8x128xf32>
      %c0_52 = arith.constant 0 : index
      %c0_53 = arith.constant 0 : index
      %144 = vector.load %arg12[%c0_52, %c0_53] : memref<8x128xf32, #tpu.memory_space<vmem>>, vector<8x128xf32>
      tpu.vector_store %arg12[%c0_52, %c0_53], %143 {strides = array<i32>} : memref<8x128xf32, #tpu.memory_space<vmem>>, vector<8x128xf32>,
    } else {
    }
    %c0 = arith.constant 0 : index
    %c0_1 = arith.constant 0 : index
    %c0_2 = arith.constant 0 : index
    %3 = vector.load %arg2[%c0, %c0_1, %c0_2] : memref<4x8x16xf32, #tpu.memory_space<vmem>>, vector<4x8x16xf32>
    %4 = vector.shape_cast %3 : vector<4x8x16xf32> to vector<32x16xf32>
    %c0_3 = arith.constant 0 : index
    %c0_4 = arith.constant 0 : index
    %5 = vector.load %arg3[%c0_3, %c0_4] : memref<16x512xf32, #tpu.memory_space<vmem>>, vector<16x512xf32>
    %cst = arith.constant dense<0.000000e+00> : vector<32x512xf32>
    %6 = tpu.matmul %4, %5, %cst {dimension_numbers = #tpu.dot_dimension_numbers<[1], [0], [0], [1], [0, 0, 1, 1], [], []>} : vector<32x16xf32>, vector<16x512xf32>, vector<32x512xf32> -> vector<32x512xf32>
    %c0_5 = arith.constant 0 : index
    %c0_6 = arith.constant 0 : index
    %7 = vector.load %arg5[%c0_5, %c0_6] : memref<1x512xf32, #tpu.memory_space<vmem>>, vector<1x512xf32>
    %8 = vector.broadcast %7 : vector<1x512xf32> to vector<32x512xf32>
    %9 = arith.addf %6, %8 : vector<32x512xf32>
    %c0_7 = arith.constant 0 : index
    %c0_8 = arith.constant 0 : index
    %10 = vector.load %arg4[%c0_7, %c0_8] : memref<128x512xf32, #tpu.memory_space<vmem>>, vector<128x512xf32>
    %c0_9 = arith.constant 0 : index
    %c0_10 = arith.constant 0 : index
    %11 = vector.load %arg11[%c0_9, %c0_10] : memref<8x128xf32, #tpu.memory_space<vmem>>, vector<8x128xf32>
    %c0_11 = arith.constant 0 : index
    %c0_12 = arith.constant 0 : index
    %12 = vector.load %arg12[%c0_11, %c0_12] : memref<8x128xf32, #tpu.memory_space<vmem>>, vector<8x128xf32>
    %13 = vector.extract_strided_slice %9 {offsets = [0, 0], sizes = [8, 512], strides = [1, 1]} : vector<32x512xf32> to vector<8x512xf32>
    %cst_13 = arith.constant dense<0.000000e+00> : vector<8x512xf32>
    %14 = tpu.matmul %11, %10, %cst_13 {dimension_numbers = #tpu.dot_dimension_numbers<[1], [0], [0], [1], [0, 0, 1, 1], [], []>} : vector<8x128xf32>, vector<128x512xf32>, vector<8x512xf32> -> vector<8x512xf32>
    %15 = arith.addf %13, %14 : vector<8x512xf32>
    %16 = vector.extract_strided_slice %15 {offsets = [0, 0], sizes = [8, 128], strides = [1, 1]} : vector<8x512xf32> to vector<8x128xf32>
    %17 = arith.negf %16 : vector<8x128xf32>
    %18 = math.exp %17 : vector<8x128xf32>
    %cst_14 = arith.constant 1.000000e+00 : f32
    %19 = vector.broadcast %cst_14 : f32 to vector<8x128xf32>
    %20 = arith.addf %19, %18 : vector<8x128xf32>
    %21 = arith.divf %19, %20 : vector<8x128xf32>
    %22 = vector.extract_strided_slice %15 {offsets = [0, 128], sizes = [8, 128], strides = [1, 1]} : vector<8x512xf32> to vector<8x128xf32>
    %23 = arith.negf %22 : vector<8x128xf32>
    %24 = math.exp %23 : vector<8x128xf32>
    %cst_15 = arith.constant 1.000000e+00 : f32
    %25 = vector.broadcast %cst_15 : f32 to vector<8x128xf32>
    %26 = arith.addf %25, %24 : vector<8x128xf32>
    %27 = arith.divf %25, %26 : vector<8x128xf32>
    %28 = vector.extract_strided_slice %15 {offsets = [0, 256], sizes = [8, 128], strides = [1, 1]} : vector<8x512xf32> to vector<8x128xf32>
    %29 = math.tanh %28 : vector<8x128xf32>
    %30 = vector.extract_strided_slice %15 {offsets = [0, 384], sizes = [8, 128], strides = [1, 1]} : vector<8x512xf32> to vector<8x128xf32>
    %31 = arith.negf %30 : vector<8x128xf32>
    %32 = math.exp %31 : vector<8x128xf32>
    %cst_16 = arith.constant 1.000000e+00 : f32
    %33 = vector.broadcast %cst_16 : f32 to vector<8x128xf32>
    %34 = arith.addf %33, %32 : vector<8x128xf32>
    %35 = arith.divf %33, %34 : vector<8x128xf32>
    %36 = arith.mulf %27, %12 : vector<8x128xf32>
    %37 = arith.mulf %21, %29 : vector<8x128xf32>
    %38 = arith.addf %36, %37 : vector<8x128xf32>
    %39 = math.tanh %38 : vector<8x128xf32>
    %40 = arith.mulf %35, %39 : vector<8x128xf32>
    %c0_17 = arith.constant 0 : index
    %c0_18 = arith.constant 0 : index
    %c0_19 = arith.constant 0 : index
    %41 = vector.load %arg8[%c0_17, %c0_18, %c0_19] : memref<4x8x128xf32, #tpu.memory_space<vmem>>, vector<1x8x128xf32>
    %42 = vector.shape_cast %41 : vector<1x8x128xf32> to vector<8x128xf32>
    %43 = vector.shape_cast %40 : vector<8x128xf32> to vector<1x8x128xf32>
    tpu.vector_store %arg8[%c0_17, %c0_18, %c0_19], %43 {strides = array<i32>} : memref<4x8x128xf32, #tpu.memory_space<vmem>>, vector<1x8x128xf32>,
    %44 = vector.extract_strided_slice %9 {offsets = [8, 0], sizes = [8, 512], strides = [1, 1]} : vector<32x512xf32> to vector<8x512xf32>
    %cst_20 = arith.constant dense<0.000000e+00> : vector<8x512xf32>
    %45 = tpu.matmul %40, %10, %cst_20 {dimension_numbers = #tpu.dot_dimension_numbers<[1], [0], [0], [1], [0, 0, 1, 1], [], []>} : vector<8x128xf32>, vector<128x512xf32>, vector<8x512xf32> -> vector<8x512xf32>
    %46 = arith.addf %44, %45 : vector<8x512xf32>
    %47 = vector.extract_strided_slice %46 {offsets = [0, 0], sizes = [8, 128], strides = [1, 1]} : vector<8x512xf32> to vector<8x128xf32>
    %48 = arith.negf %47 : vector<8x128xf32>
    %49 = math.exp %48 : vector<8x128xf32>
    %cst_21 = arith.constant 1.000000e+00 : f32
    %50 = vector.broadcast %cst_21 : f32 to vector<8x128xf32>
    %51 = arith.addf %50, %49 : vector<8x128xf32>
    %52 = arith.divf %50, %51 : vector<8x128xf32>
    %53 = vector.extract_strided_slice %46 {offsets = [0, 128], sizes = [8, 128], strides = [1, 1]} : vector<8x512xf32> to vector<8x128xf32>
    %54 = arith.negf %53 : vector<8x128xf32>
    %55 = math.exp %54 : vector<8x128xf32>
    %cst_22 = arith.constant 1.000000e+00 : f32
    %56 = vector.broadcast %cst_22 : f32 to vector<8x128xf32>
    %57 = arith.addf %56, %55 : vector<8x128xf32>
    %58 = arith.divf %56, %57 : vector<8x128xf32>
    %59 = vector.extract_strided_slice %46 {offsets = [0, 256], sizes = [8, 128], strides = [1, 1]} : vector<8x512xf32> to vector<8x128xf32>
    %60 = math.tanh %59 : vector<8x128xf32>
    %61 = vector.extract_strided_slice %46 {offsets = [0, 384], sizes = [8, 128], strides = [1, 1]} : vector<8x512xf32> to vector<8x128xf32>
    %62 = arith.negf %61 : vector<8x128xf32>
    %63 = math.exp %62 : vector<8x128xf32>
    %cst_23 = arith.constant 1.000000e+00 : f32
    %64 = vector.broadcast %cst_23 : f32 to vector<8x128xf32>
    %65 = arith.addf %64, %63 : vector<8x128xf32>
    %66 = arith.divf %64, %65 : vector<8x128xf32>
    %67 = arith.mulf %58, %38 : vector<8x128xf32>
    %68 = arith.mulf %52, %60 : vector<8x128xf32>
    %69 = arith.addf %67, %68 : vector<8x128xf32>
    %70 = math.tanh %69 : vector<8x128xf32>
    %71 = arith.mulf %66, %70 : vector<8x128xf32>
    %c1 = arith.constant 1 : index
    %c0_24 = arith.constant 0 : index
    %c0_25 = arith.constant 0 : index
    %72 = vector.load %arg8[%c1, %c0_24, %c0_25] : memref<4x8x128xf32, #tpu.memory_space<vmem>>, vector<1x8x128xf32>
    %73 = vector.shape_cast %72 : vector<1x8x128xf32> to vector<8x128xf32>
    %74 = vector.shape_cast %71 : vector<8x128xf32> to vector<1x8x128xf32>
    tpu.vector_store %arg8[%c1, %c0_24, %c0_25], %74 {strides = array<i32>} : memref<4x8x128xf32, #tpu.memory_space<vmem>>, vector<1x8x128xf32>,
    %75 = vector.extract_strided_slice %9 {offsets = [16, 0], sizes = [8, 512], strides = [1, 1]} : vector<32x512xf32> to vector<8x512xf32>
    %cst_26 = arith.constant dense<0.000000e+00> : vector<8x512xf32>
    %76 = tpu.matmul %71, %10, %cst_26 {dimension_numbers = #tpu.dot_dimension_numbers<[1], [0], [0], [1], [0, 0, 1, 1], [], []>} : vector<8x128xf32>, vector<128x512xf32>, vector<8x512xf32> -> vector<8x512xf32>
    %77 = arith.addf %75, %76 : vector<8x512xf32>
    %78 = vector.extract_strided_slice %77 {offsets = [0, 0], sizes = [8, 128], strides = [1, 1]} : vector<8x512xf32> to vector<8x128xf32>
    %79 = arith.negf %78 : vector<8x128xf32>
    %80 = math.exp %79 : vector<8x128xf32>
    %cst_27 = arith.constant 1.000000e+00 : f32
    %81 = vector.broadcast %cst_27 : f32 to vector<8x128xf32>
    %82 = arith.addf %81, %80 : vector<8x128xf32>
    %83 = arith.divf %81, %82 : vector<8x128xf32>
    %84 = vector.extract_strided_slice %77 {offsets = [0, 128], sizes = [8, 128], strides = [1, 1]} : vector<8x512xf32> to vector<8x128xf32>
    %85 = arith.negf %84 : vector<8x128xf32>
    %86 = math.exp %85 : vector<8x128xf32>
    %cst_28 = arith.constant 1.000000e+00 : f32
    %87 = vector.broadcast %cst_28 : f32 to vector<8x128xf32>
    %88 = arith.addf %87, %86 : vector<8x128xf32>
    %89 = arith.divf %87, %88 : vector<8x128xf32>
    %90 = vector.extract_strided_slice %77 {offsets = [0, 256], sizes = [8, 128], strides = [1, 1]} : vector<8x512xf32> to vector<8x128xf32>
    %91 = math.tanh %90 : vector<8x128xf32>
    %92 = vector.extract_strided_slice %77 {offsets = [0, 384], sizes = [8, 128], strides = [1, 1]} : vector<8x512xf32> to vector<8x128xf32>
    %93 = arith.negf %92 : vector<8x128xf32>
    %94 = math.exp %93 : vector<8x128xf32>
    %cst_29 = arith.constant 1.000000e+00 : f32
    %95 = vector.broadcast %cst_29 : f32 to vector<8x128xf32>
    %96 = arith.addf %95, %94 : vector<8x128xf32>
    %97 = arith.divf %95, %96 : vector<8x128xf32>
    %98 = arith.mulf %89, %69 : vector<8x128xf32>
    %99 = arith.mulf %83, %91 : vector<8x128xf32>
    %100 = arith.addf %98, %99 : vector<8x128xf32>
    %101 = math.tanh %100 : vector<8x128xf32>
    %102 = arith.mulf %97, %101 : vector<8x128xf32>
    %c2 = arith.constant 2 : index
    %c0_30 = arith.constant 0 : index
    %c0_31 = arith.constant 0 : index
    %103 = vector.load %arg8[%c2, %c0_30, %c0_31] : memref<4x8x128xf32, #tpu.memory_space<vmem>>, vector<1x8x128xf32>
    %104 = vector.shape_cast %103 : vector<1x8x128xf32> to vector<8x128xf32>
    %105 = vector.shape_cast %102 : vector<8x128xf32> to vector<1x8x128xf32>
    tpu.vector_store %arg8[%c2, %c0_30, %c0_31], %105 {strides = array<i32>} : memref<4x8x128xf32, #tpu.memory_space<vmem>>, vector<1x8x128xf32>,
    %106 = vector.extract_strided_slice %9 {offsets = [24, 0], sizes = [8, 512], strides = [1, 1]} : vector<32x512xf32> to vector<8x512xf32>
    %cst_32 = arith.constant dense<0.000000e+00> : vector<8x512xf32>
    %107 = tpu.matmul %102, %10, %cst_32 {dimension_numbers = #tpu.dot_dimension_numbers<[1], [0], [0], [1], [0, 0, 1, 1], [], []>} : vector<8x128xf32>, vector<128x512xf32>, vector<8x512xf32> -> vector<8x512xf32>
    %108 = arith.addf %106, %107 : vector<8x512xf32>
    %109 = vector.extract_strided_slice %108 {offsets = [0, 0], sizes = [8, 128], strides = [1, 1]} : vector<8x512xf32> to vector<8x128xf32>
    %110 = arith.negf %109 : vector<8x128xf32>
    %111 = math.exp %110 : vector<8x128xf32>
    %cst_33 = arith.constant 1.000000e+00 : f32
    %112 = vector.broadcast %cst_33 : f32 to vector<8x128xf32>
    %113 = arith.addf %112, %111 : vector<8x128xf32>
    %114 = arith.divf %112, %113 : vector<8x128xf32>
    %115 = vector.extract_strided_slice %108 {offsets = [0, 128], sizes = [8, 128], strides = [1, 1]} : vector<8x512xf32> to vector<8x128xf32>
    %116 = arith.negf %115 : vector<8x128xf32>
    %117 = math.exp %116 : vector<8x128xf32>
    %cst_34 = arith.constant 1.000000e+00 : f32
    %118 = vector.broadcast %cst_34 : f32 to vector<8x128xf32>
    %119 = arith.addf %118, %117 : vector<8x128xf32>
    %120 = arith.divf %118, %119 : vector<8x128xf32>
    %121 = vector.extract_strided_slice %108 {offsets = [0, 256], sizes = [8, 128], strides = [1, 1]} : vector<8x512xf32> to vector<8x128xf32>
    %122 = math.tanh %121 : vector<8x128xf32>
    %123 = vector.extract_strided_slice %108 {offsets = [0, 384], sizes = [8, 128], strides = [1, 1]} : vector<8x512xf32> to vector<8x128xf32>
    %124 = arith.negf %123 : vector<8x128xf32>
    %125 = math.exp %124 : vector<8x128xf32>
    %cst_35 = arith.constant 1.000000e+00 : f32
    %126 = vector.broadcast %cst_35 : f32 to vector<8x128xf32>
    %127 = arith.addf %126, %125 : vector<8x128xf32>
    %128 = arith.divf %126, %127 : vector<8x128xf32>
    %129 = arith.mulf %120, %100 : vector<8x128xf32>
    %130 = arith.mulf %114, %122 : vector<8x128xf32>
    %131 = arith.addf %129, %130 : vector<8x128xf32>
    %132 = math.tanh %131 : vector<8x128xf32>
    %133 = arith.mulf %128, %132 : vector<8x128xf32>
    %c3 = arith.constant 3 : index
    %c0_36 = arith.constant 0 : index
    %c0_37 = arith.constant 0 : index
    %134 = vector.load %arg8[%c3, %c0_36, %c0_37] : memref<4x8x128xf32, #tpu.memory_space<vmem>>, vector<1x8x128xf32>
    %135 = vector.shape_cast %134 : vector<1x8x128xf32> to vector<8x128xf32>
    %136 = vector.shape_cast %133 : vector<8x128xf32> to vector<1x8x128xf32>
    tpu.vector_store %arg8[%c3, %c0_36, %c0_37], %136 {strides = array<i32>} : memref<4x8x128xf32, #tpu.memory_space<vmem>>, vector<1x8x128xf32>,
    %c0_38 = arith.constant 0 : index
    %c0_39 = arith.constant 0 : index
    %137 = vector.load %arg11[%c0_38, %c0_39] : memref<8x128xf32, #tpu.memory_space<vmem>>, vector<8x128xf32>
    tpu.vector_store %arg11[%c0_38, %c0_39], %133 {strides = array<i32>} : memref<8x128xf32, #tpu.memory_space<vmem>>, vector<8x128xf32>,
    %c0_40 = arith.constant 0 : index
    %c0_41 = arith.constant 0 : index
    %138 = vector.load %arg12[%c0_40, %c0_41] : memref<8x128xf32, #tpu.memory_space<vmem>>, vector<8x128xf32>
    tpu.vector_store %arg12[%c0_40, %c0_41], %131 {strides = array<i32>} : memref<8x128xf32, #tpu.memory_space<vmem>>, vector<8x128xf32>,
    %c0_42 = arith.constant 0 : index
    %c0_43 = arith.constant 0 : index
    %139 = vector.load %arg9[%c0_42, %c0_43] : memref<8x128xf32, #tpu.memory_space<vmem>>, vector<8x128xf32>
    tpu.vector_store %arg9[%c0_42, %c0_43], %133 {strides = array<i32>} : memref<8x128xf32, #tpu.memory_space<vmem>>, vector<8x128xf32>,
    %c0_44 = arith.constant 0 : index
    %c0_45 = arith.constant 0 : index
    %140 = vector.load %arg10[%c0_44, %c0_45] : memref<8x128xf32, #tpu.memory_space<vmem>>, vector<8x128xf32>
    tpu.vector_store %arg10[%c0_44, %c0_45], %131 {strides = array<i32>} : memref<8x128xf32, #tpu.memory_space<vmem>>, vector<8x128xf32>,
    return
  }
  func.func @transform_0(%arg0: i32, %arg1: i32) -> (i32, i32, i32) {
    %c0_i32 = arith.constant 0 : i32
    %c0_i32_0 = arith.constant 0 : i32
    return %arg1, %arg0, %c0_i32 : i32, i32, i32
  }
  func.func @transform_1(%arg0: i32, %arg1: i32) -> (i32, i32) {
    %c0_i32 = arith.constant 0 : i32
    %c0_i32_0 = arith.constant 0 : i32
    %c0_i32_1 = arith.constant 0 : i32
    return %c0_i32, %c0_i32_0 : i32, i32
  }
  func.func @transform_2(%arg0: i32, %arg1: i32) -> (i32, i32) {
    %c0_i32 = arith.constant 0 : i32
    %c0_i32_0 = arith.constant 0 : i32
    %c0_i32_1 = arith.constant 0 : i32
    return %c0_i32, %c0_i32_0 : i32, i32
  }
  func.func @transform_3(%arg0: i32, %arg1: i32) -> (i32, i32) {
    %c0_i32 = arith.constant 0 : i32
    %c0_i32_0 = arith.constant 0 : i32
    %c0_i32_1 = arith.constant 0 : i32
    return %c0_i32, %c0_i32_0 : i32, i32
  }
  func.func @transform_4(%arg0: i32, %arg1: i32) -> (i32, i32) {
    %c0_i32 = arith.constant 0 : i32
    %c0_i32_0 = arith.constant 0 : i32
    return %arg0, %c0_i32 : i32, i32
  }
  func.func @transform_5(%arg0: i32, %arg1: i32) -> (i32, i32) {
    %c0_i32 = arith.constant 0 : i32
    %c0_i32_0 = arith.constant 0 : i32
    return %arg0, %c0_i32 : i32, i32
  }
  func.func @transform_6(%arg0: i32, %arg1: i32) -> (i32, i32, i32) {
    %c0_i32 = arith.constant 0 : i32
    %c0_i32_0 = arith.constant 0 : i32
    return %arg1, %arg0, %c0_i32 : i32, i32, i32
  }
  func.func @transform_7(%arg0: i32, %arg1: i32) -> (i32, i32) {
    %c0_i32 = arith.constant 0 : i32
    %c0_i32_0 = arith.constant 0 : i32
    return %arg0, %c0_i32 : i32, i32
  }
  func.func @transform_8(%arg0: i32, %arg1: i32) -> (i32, i32) {
    %c0_i32 = arith.constant 0 : i32
    %c0_i32_0 = arith.constant 0 : i32
    return %arg0, %c0_i32 : i32, i32
  }
}

</mosaic_0001>

<bundles_post_ra>
// kernel: lstm_layer_forward.1
= control target key start
LH: loop header
LB: loop body
LE: loop exit
PB: predicated region body
PF: predicated region fallthrough
CT: control target
= control target key end

     0   :  { %s2043_s27 = smov 0   ;;  %s2045_s28 = smov 0   ;;  %s2567_s0 = inlined_call_operand.vmem [shape: f32[8,8,16], index: 0, kind: input, shape index: {}]   ;;  %s2568_s1 = inlined_call_operand.vmem [shape: f32[16,512], index: 1, kind: input, shape index: {}]   ;;  %s2569_s2 = inlined_call_operand.vmem [shape: f32[128,512], index: 2, kind: input, shape index: {}]   ;;  %s2570_s3 = inlined_call_operand.vmem [shape: f32[1,512], index: 3, kind: input, shape index: {}]   ;;  %s2571_s4 = inlined_call_operand.vmem [shape: f32[8,128], index: 4, kind: input, shape index: {}]   ;;  %s2572_s5 = inlined_call_operand.vmem [shape: f32[8,128], index: 5, kind: input, shape index: {}]   ;;  %s2573_s6 = inlined_call_operand.vmem [shape: f32[8,8,128], index: 6, kind: output, shape index: {0}]   ;;  %s2574_s7 = inlined_call_operand.vmem [shape: f32[8,128], index: 7, kind: output, shape index: {1}]   ;;  %s2575_s8 = inlined_call_operand.vmem [shape: f32[8,128], index: 8, kind: output, shape index: {2}]  }
   0x1   :  { %s2047_s29 = smov 0  }
   0x2 LB: > { %s28_s30 = sadd.s32 1, %s1991_s28  ;;  %p1555_p0 = scmp.ge.s32.totalorder %s1995_s29, 1  ;;  %s1995_s29 = sphi %s2047_s29, %s19_s29   ;;  %s1991_s28 = sphi %s2045_s28, %s2577_s28   ;;  %s1987_s27 = sphi %s2043_s27, %s2576_s27  }
   0x3   : > { %p29_p1 = scmp.ge.s32.totalorder %s28_s30, 2  ;;  %p305_p2 = scmp.lt.s32.totalorder %s1995_s29, 3 }
   0x5   : > { %s2579_s30 = smov (%p29_p1, %s28_s30), 0  ;;  %p306_p3 = pnand %p1555_p0, %p305_p2 }
   0x6   : > { %s1556_s9 = sshll.u32 (!%p306_p3), %s1987_s27, 2  ;;  %p1560_p5 = scmp.ne.s32.totalorder (!%p306_p3), %s1987_s27, 0 }
   0x7   : > { %309 = sbr.rel (%p306_p3) target bundleno = 1095 (0x447), region = 44  ;;  %p362_p4 = scmp.lt.s32.totalorder (!%p306_p3), %s1556_s9, 7 }
   0xe   : > { %s2581_s9 = smov (!%p362_p4, %s1556_s9), 7  ;;  %398 = sbr.rel (%p1560_p5) target bundleno = 21 (0x15), region = 48 }
   0xf   : > { %s1557_s10 = sshll.u32 %s2581_s9, 3  ;;  %v399_v0 = vld [vmem:[%s2571_s4] sm:$0xff] (!%p1560_p5) }
  0x10   : > { %s2064_s13 = scalar_lea.vmem %s2567_s0, %s1557_s10  ;;  %s2069_s16 = scalar_lea.vmem %s2573_s6, %s1557_s10  ;;  %v401_v1 = vld [vmem:[%s2572_s5] sm:$0xff] (!%p1560_p5)  ;;  %400 = vst [vmem:[#allocation2] sm:$0xff] (!%p1560_p5), %v399_v0 }
  0x11   : > { %402 = vst [vmem:[#allocation3] sm:$0xff] (!%p1560_p5), %v401_v1 }
  0x15 PF: > { %v408_v2 = vld [vmem:[%s2568_s1 + $0x8] sm:$0xff]  ;;  %v410_v4 = vld [vmem:[%s2568_s1 + $0x18] sm:$0xff]  ;;  %v407_v7 = vld [vmem:[%s2568_s1] sm:$0xff]  ;;  %v1997_v9 = vmov 0.0   ;;  %vm437_vm0 = vcmask 130048  }
  0x16   : > { %v412_v3 = vld [vmem:[%s2568_s1 + $0x28] sm:$0xff]  ;;  %v414_v6 = vld [vmem:[%s2568_s1 + $0x38] sm:$0xff]  ;;  %v411_v8 = vld [vmem:[%s2568_s1 + $0x20] sm:$0xff]  ;;  %514 = vmatprep.mubr.f32.mxu0 %v1997_v9  ;;  %603 = vmatprep.mubr.f32.mxu1 %v1997_v9 }
  0x17   : > { %v1588_v5 = vpack.c.bf16 %v412_v3, %v408_v2  ;;  %v1592_v10 = vpack.c.bf16 %v414_v6, %v410_v4  ;;  %v1590_v11 = vpack.c.bf16 %v411_v8, %v407_v7  ;;  %v409_v12 = vld [vmem:[%s2568_s1 + $0x10] sm:$0xff]  ;;  %v629_v14 = vld [vmem:[%s2569_s2 + $0x8] sm:$0xff]  ;;  %v631_v17 = vld [vmem:[%s2569_s2 + $0x18] sm:$0xff] }
  0x18   : > { %v413_v13 = vld [vmem:[%s2568_s1 + $0x30] sm:$0xff]  ;;  %v633_v16 = vld [vmem:[%s2569_s2 + $0x28] sm:$0xff]  ;;  %v635_v18 = vld [vmem:[%s2569_s2 + $0x38] sm:$0xff] }
  0x19   : > { %1589 = vmatprep.subr.bf16.mxu0 %v1588_v5  ;;  %v1594_v15 = vpack.c.bf16 %v413_v13, %v409_v12  ;;  %1593 = vmatprep.subr.bf16.mxu1 %v1592_v10  ;;  %v2115_v19 = vpack.c.bf16 %v633_v16, %v629_v14  ;;  %v2117_v20 = vpack.c.bf16 %v635_v18, %v631_v17  ;;  %v403_v21 = vld [vmem:[%s2064_s13] sm:$0xff]  ;;  %v630_v25 = vld [vmem:[%s2569_s2 + $0x10] sm:$0xff]  ;;  %v637_v27 = vld [vmem:[%s2569_s2 + $0x48] sm:$0xff] }
  0x1a   : > { %1591 = vmatpush1.bf16.msra.mxu0 %v1590_v11  ;;  %v628_v22 = vld [vmem:[%s2569_s2] sm:$0xff]  ;;  %v634_v26 = vld [vmem:[%s2569_s2 + $0x30] sm:$0xff]  ;;  %v641_v29 = vld [vmem:[%s2569_s2 + $0x68] sm:$0xff] }
  0x1b   : > { %v632_v23 = vld [vmem:[%s2569_s2 + $0x20] sm:$0xff]  ;;  %1595 = vmatpush1.bf16.msra.mxu1 %v1594_v15  ;;  %1597 = vmatprep.subr.bf16.mxu0 %v2115_v19  ;;  %v2139_v28 = vpack.c.bf16 %v634_v26, %v630_v25  ;;  %v639_v30 = vld [vmem:[%s2569_s2 + $0x58] sm:$0xff]  ;;  %v2151_v32 = vpack.c.bf16 %v641_v29, %v637_v27  ;;  %v638_v36 = vld [vmem:[%s2569_s2 + $0x50] sm:$0xff] }
  0x1c   : > { %v2126_v24 = vpack.c.bf16 %v632_v23, %v628_v22  ;;  %1629 = vmatprep.subr.bf16.mxu1 %v2117_v20  ;;  %v643_v31 = vld [vmem:[%s2569_s2 + $0x78] sm:$0xff]  ;;  %v636_v34 = vld [vmem:[%s2569_s2 + $0x40] sm:$0xff]  ;;  %v642_v38 = vld [vmem:[%s2569_s2 + $0x70] sm:$0xff] }
  0x1d   : > { %1561 = vmatmul.mubr.msk.f32.vlgmr.msra.gmra.mrb[0].mxu0 %vm437_vm0, %v403_v21  ;;  %v2153_v33 = vpack.c.bf16 %v643_v31, %v639_v30  ;;  %v640_v35 = vld [vmem:[%s2569_s2 + $0x60] sm:$0xff]  ;;  %v645_v39 = vld [vmem:[%s2569_s2 + $0x88] sm:$0xff]  ;;  %v2179_v41 = vpack.c.bf16 %v642_v38, %v638_v36  ;;  %v647_v43 = vld [vmem:[%s2569_s2 + $0x98] sm:$0xff] }
  0x1e   : > { %1565 = vmatmul.mubr.msk.f32.vlgmr.msra.gmra.mrb[0].mxu1 %vm437_vm0, %v403_v21  ;;  %1599 = vmatpush1.bf16.msra.mxu0 %v2126_v24  ;;  %v2166_v37 = vpack.c.bf16 %v640_v35, %v636_v34  ;;  %v649_v40 = vld [vmem:[%s2569_s2 + $0xa8] sm:$0xff]  ;;  %v651_v44 = vld [vmem:[%s2569_s2 + $0xb8] sm:$0xff]  ;;  %v644_v45 = vld [vmem:[%s2569_s2 + $0x80] sm:$0xff] }
  0x1f   : > { %1631 = vmatpush1.bf16.msra.mxu1 %v2139_v28  ;;  %1601 = vmatprep.subr.bf16.mxu0 %v2151_v32  ;;  %v2181_v42 = vpack.c.bf16 %v649_v40, %v645_v39  ;;  %v2193_v46 = vpack.c.bf16 %v651_v44, %v647_v43  ;;  %v648_v47 = vld [vmem:[%s2569_s2 + $0xa0] sm:$0xff]  ;;  %v646_v48 = vld [vmem:[%s2569_s2 + $0x90] sm:$0xff]  ;;  %v653_v50 = vld [vmem:[%s2569_s2 + $0xc8] sm:$0xff] }
  0x20   : > { %1633 = vmatprep.subr.bf16.mxu1 %v2153_v33  ;;  %v650_v49 = vld [vmem:[%s2569_s2 + $0xb0] sm:$0xff]  ;;  %520 = vmatprep.mubr.f32.mxu0 %v1997_v9  ;;  %v657_v51 = vld [vmem:[%s2569_s2 + $0xe8] sm:$0xff]  ;;  %v655_v52 = vld [vmem:[%s2569_s2 + $0xd8] sm:$0xff]  ;;  %v2216_v53 = vpack.c.bf16 %v648_v47, %v644_v45 }
  0x21   : > { %609 = vmatprep.mubr.f32.mxu1 %v1997_v9  ;;  %v659_v54 = vld [vmem:[%s2569_s2 + $0xf8] sm:$0xff]  ;;  %v2223_v55 = vpack.c.bf16 %v650_v49, %v646_v48  ;;  %v2225_v56 = vpack.c.bf16 %v657_v51, %v653_v50  ;;  %v652_v57 = vld [vmem:[%s2569_s2 + $0xc0] sm:$0xff]  ;;  %v654_v59 = vld [vmem:[%s2569_s2 + $0xd0] sm:$0xff] }
  0x22   : > { %1603 = vmatpush1.bf16.msra.mxu0 %v2166_v37  ;;  %v656_v58 = vld [vmem:[%s2569_s2 + $0xe0] sm:$0xff]  ;;  %v2237_v60 = vpack.c.bf16 %v659_v54, %v655_v52  ;;  %v658_v61 = vld [vmem:[%s2569_s2 + $0xf0] sm:$0xff]  ;;  %v661_v62 = vld [vmem:[%s2569_s2 + $0x108] sm:$0xff] }
  0x23   : > { %1635 = vmatpush1.bf16.msra.mxu1 %v2179_v41  ;;  %1605 = vmatprep.subr.bf16.mxu0 %v2181_v42  ;;  %v665_v63 = vld [vmem:[%s2569_s2 + $0x128] sm:$0xff]  ;;  %v663_v0 = vld [vmem:[%s2569_s2 + $0x118] sm:$0xff]  ;;  %v2255_v2 = vpack.c.bf16 %v656_v58, %v652_v57  ;;  %v2260_v4 = vpack.c.bf16 %v658_v61, %v654_v59  ;;  %v660_v6 = vld [vmem:[%s2569_s2 + $0x100] sm:$0xff] }
  0x24   : > { %1637 = vmatprep.subr.bf16.mxu1 %v2193_v46  ;;  %v667_v1 = vld [vmem:[%s2569_s2 + $0x138] sm:$0xff]  ;;  %v404_v3 = vld [vmem:[%s2064_s13 + $0x8] sm:$0xff]  ;;  %v2262_v5 = vpack.c.bf16 %v665_v63, %v661_v62  ;;  %v664_v7 = vld [vmem:[%s2569_s2 + $0x120] sm:$0xff] }
  0x25   : > { %v662_v8 = vld [vmem:[%s2569_s2 + $0x110] sm:$0xff]  ;;  %v2274_v10 = vpack.c.bf16 %v667_v1, %v663_v0  ;;  %1562 = vmatmul.mubr.msk.f32.gmra.mrb[2].mxu0 %vm437_vm0, %v404_v3  ;;  %v669_v12 = vld [vmem:[%s2569_s2 + $0x148] sm:$0xff]  ;;  %1566 = vmatmul.mubr.msk.f32.gmra.mrb[2].mxu1 %vm437_vm0, %v404_v3  ;;  %v671_v14 = vld [vmem:[%s2569_s2 + $0x158] sm:$0xff]  ;;  %v2296_v17 = vpack.c.bf16 %v664_v7, %v660_v6  ;;  %v417_v6 = vlaneseq }
  0x26   : > { %1607 = vmatpush1.bf16.msra.mxu0 %v2216_v53  ;;  %v666_v11 = vld [vmem:[%s2569_s2 + $0x130] sm:$0xff]  ;;  %v673_v13 = vld [vmem:[%s2569_s2 + $0x168] sm:$0xff]  ;;  %v675_v15 = vld [vmem:[%s2569_s2 + $0x178] sm:$0xff]  ;;  %526 = vmatprep.mubr.f32.mxu0 %v1997_v9 }
  0x27   : > { %1639 = vmatpush1.bf16.msra.mxu1 %v2223_v55  ;;  %1609 = vmatprep.subr.bf16.mxu0 %v2225_v56  ;;  %v405_v16 = vld [vmem:[%s2064_s13 + $0x10] sm:$0xff]  ;;  %v2301_v18 = vpack.c.bf16 %v666_v11, %v662_v8  ;;  %v2303_v21 = vpack.c.bf16 %v673_v13, %v669_v12  ;;  %v668_v22 = vld [vmem:[%s2569_s2 + $0x140] sm:$0xff]  ;;  %v2315_v26 = vpack.c.bf16 %v675_v15, %v671_v14  ;;  %v677_v29 = vld [vmem:[%s2569_s2 + $0x188] sm:$0xff]  ;;  %v418_v7 = vshrl.u32 %v417_v6, 7 }
  0x28   : > { %1641 = vmatprep.subr.bf16.mxu1 %v2237_v60  ;;  %615 = vmatprep.mubr.f32.mxu1 %v1997_v9  ;;  %v672_v23 = vld [vmem:[%s2569_s2 + $0x160] sm:$0xff]  ;;  %v670_v25 = vld [vmem:[%s2569_s2 + $0x150] sm:$0xff]  ;;  %v681_v30 = vld [vmem:[%s2569_s2 + $0x1a8] sm:$0xff] }
  0x29   : > { %v674_v27 = vld [vmem:[%s2569_s2 + $0x170] sm:$0xff]  ;;  %1563 = vmatmul.mubr.msk.f32.gmra.mrb[4].mxu0 %vm437_vm0, %v405_v16  ;;  %1567 = vmatmul.mubr.msk.f32.gmra.mrb[4].mxu1 %vm437_vm0, %v405_v16  ;;  %v679_v31 = vld [vmem:[%s2569_s2 + $0x198] sm:$0xff]  ;;  %v2337_v36 = vpack.c.bf16 %v672_v23, %v668_v22  ;;  %v2344_v39 = vpack.c.bf16 %v681_v30, %v677_v29  ;;  %v676_v40 = vld [vmem:[%s2569_s2 + $0x180] sm:$0xff]  ;;  %v419_v8 = vsub.s32 0, %v418_v7  ;;  %v423_v12 = vsub.s32 1, %v418_v7 }
  0x2a   : > { %1611 = vmatpush1.bf16.msra.mxu0 %v2255_v2  ;;  %v683_v34 = vld [vmem:[%s2569_s2 + $0x1b8] sm:$0xff]  ;;  %532 = vmatprep.mubr.f32.mxu0 %v1997_v9  ;;  %v2342_v38 = vpack.c.bf16 %v674_v27, %v670_v25  ;;  %v680_v43 = vld [vmem:[%s2569_s2 + $0x1a0] sm:$0xff]  ;;  %v678_v44 = vld [vmem:[%s2569_s2 + $0x190] sm:$0xff]  ;;  %v431_v16 = vsub.s32 3, %v418_v7 }
  0x2b   : > { %1643 = vmatpush1.bf16.msra.mxu1 %v2260_v4  ;;  %1613 = vmatprep.subr.bf16.mxu0 %v2262_v5  ;;  %v406_v35 = vld [vmem:[%s2064_s13 + $0x18] sm:$0xff]  ;;  %v2356_v45 = vpack.c.bf16 %v683_v34, %v679_v31  ;;  %v682_v47 = vld [vmem:[%s2569_s2 + $0x1b0] sm:$0xff]  ;;  %v685_v48 = vld [vmem:[%s2569_s2 + $0x1c8] sm:$0xff]  ;;  %v2377_v52 = vpack.c.bf16 %v680_v43, %v676_v40 }
  0x2c   : > { %1645 = vmatprep.subr.bf16.mxu1 %v2274_v10  ;;  %621 = vmatprep.mubr.f32.mxu1 %v1997_v9  ;;  %v689_v49 = vld [vmem:[%s2569_s2 + $0x1e8] sm:$0xff]  ;;  %v687_v50 = vld [vmem:[%s2569_s2 + $0x1d8] sm:$0xff]  ;;  %v2382_v54 = vpack.c.bf16 %v682_v47, %v678_v44  ;;  %v684_v58 = vld [vmem:[%s2569_s2 + $0x1c0] sm:$0xff] }
  0x2d   : > { %1564 = vmatmul.mubr.msk.f32.gmra.mrb[6].mxu0 %vm437_vm0, %v406_v35  ;;  %1568 = vmatmul.mubr.msk.f32.gmra.mrb[6].mxu1 %vm437_vm0, %v406_v35  ;;  %v691_v51 = vld [vmem:[%s2569_s2 + $0x1f8] sm:$0xff]  ;;  %v2384_v57 = vpack.c.bf16 %v689_v49, %v685_v48  ;;  %v688_v59 = vld [vmem:[%s2569_s2 + $0x1e0] sm:$0xff]  ;;  %v686_v62 = vld [vmem:[%s2569_s2 + $0x1d0] sm:$0xff]  ;;  %v427_v35 = vsub.s32 2, %v418_v7 }
  0x2e   : > { %1615 = vmatpush1.bf16.msra.mxu0 %v2296_v17  ;;  %758 = vmatprep.mubr.f32.mxu0 %v1997_v9  ;;  %v2393_v61 = vpack.c.bf16 %v691_v51, %v687_v50  ;;  %v690_v63 = vld [vmem:[%s2569_s2 + $0x1f0] sm:$0xff]  ;;  %v2402_v0 = vpack.c.bf16 %v688_v59, %v684_v58  ;;  %v692_v3 = vld [vmem:[#allocation2] sm:$0xff] }
  0x2f   : > { %1647 = vmatpush1.bf16.msra.mxu1 %v2301_v18  ;;  %1617 = vmatprep.subr.bf16.mxu0 %v2303_v21  ;;  %v2406_v1 = vpack.c.bf16 %v690_v63, %v686_v62  ;;  %v415_v11 = vld [vmem:[%s2570_s3] sm:$0xf]  ;;  %v693_v62 = vld [vmem:[#allocation3] sm:$0xff] }
  0x30   : > { %1649 = vmatprep.subr.bf16.mxu1 %v2315_v26  ;;  %829 = vmatprep.mubr.f32.mxu1 %v1997_v9  ;;  %v2450_v13 = vrot.slane %v415_v11, %v419_v8  ;;  %v2452_v14 = vrot.slane %v415_v11, %v423_v12  ;;  %v2456_v34 = vrot.slane %v415_v11, %v431_v16 }
  0x31   : > { %v2459_v43 = vrot.slane %v415_v11, %v427_v35 }
  0x32   : > { %1619 = vmatpush1.bf16.msra.mxu0 %v2337_v36 }
  0x33   : > { %1651 = vmatpush1.bf16.msra.mxu1 %v2342_v38  ;;  %1621 = vmatprep.subr.bf16.mxu0 %v2344_v39 }
  0x34   : > { %1653 = vmatprep.subr.bf16.mxu1 %v2356_v45 }
  0x36   : > { %1623 = vmatpush1.bf16.msra.mxu0 %v2377_v52 }
  0x37   : > { %1655 = vmatpush1.bf16.msra.mxu1 %v2382_v54  ;;  %1625 = vmatprep.subr.bf16.mxu0 %v2384_v57 }
  0x38   : > { %1657 = vmatprep.subr.bf16.mxu1 %v2393_v61 }
  0x3a   : > { %1627 = vmatpush1.bf16.msra.mxu0 %v2402_v0 }
  0x3b   : > { %1659 = vmatpush1.bf16.msra.mxu1 %v2406_v1  ;;  %1661 = vmatprep.subr.bf16.mxu0 %v2115_v19 }
  0x3c   : > { %1693 = vmatprep.subr.bf16.mxu1 %v2117_v20 }
  0x3d   : > { %759 = vmatmul.mubr.f32.vlgmr.msra.gmra.mrb[0].mxu0 %v692_v3 }
  0x3e   : > { %830 = vmatmul.mubr.f32.vlgmr.msra.gmra.mrb[0].mxu1 %v692_v3  ;;  %1663 = vmatpush1.bf16.msra.mxu0 %v2126_v24 }
  0x3f   : > { %1695 = vmatpush1.bf16.msra.mxu1 %v2139_v28  ;;  %1665 = vmatprep.subr.bf16.mxu0 %v2151_v32 }
  0x40   : > { %1697 = vmatprep.subr.bf16.mxu1 %v2153_v33  ;;  %929 = vmatprep.mubr.f32.mxu0 %v1997_v9 }
  0x41   : > { %1000 = vmatprep.mubr.f32.mxu1 %v1997_v9 }
  0x42   : > { %1667 = vmatpush1.bf16.msra.mxu0 %v2166_v37 }
  0x43   : > { %1699 = vmatpush1.bf16.msra.mxu1 %v2179_v41  ;;  %1669 = vmatprep.subr.bf16.mxu0 %v2181_v42 }
  0x44   : > { %1701 = vmatprep.subr.bf16.mxu1 %v2193_v46 }
  0x46   : > { %1671 = vmatpush1.bf16.msra.mxu0 %v2216_v53 }
  0x47   : > { %1703 = vmatpush1.bf16.msra.mxu1 %v2223_v55  ;;  %1673 = vmatprep.subr.bf16.mxu0 %v2225_v56 }
  0x48   : > { %1705 = vmatprep.subr.bf16.mxu1 %v2237_v60 }
  0x4a   : > { %1675 = vmatpush1.bf16.msra.mxu0 %v2255_v2 }
  0x4b   : > { %1707 = vmatpush1.bf16.msra.mxu1 %v2260_v4  ;;  %1677 = vmatprep.subr.bf16.mxu0 %v2262_v5 }
  0x4c   : > { %1709 = vmatprep.subr.bf16.mxu1 %v2274_v10 }
  0x4e   : > { %1679 = vmatpush1.bf16.msra.mxu0 %v2296_v17 }
  0x4f   : > { %1711 = vmatpush1.bf16.msra.mxu1 %v2301_v18  ;;  %1681 = vmatprep.subr.bf16.mxu0 %v2303_v21 }
  0x50   : > { %1713 = vmatprep.subr.bf16.mxu1 %v2315_v26 }
  0x52   : > { %1683 = vmatpush1.bf16.msra.mxu0 %v2337_v36 }
  0x53   : > { %1715 = vmatpush1.bf16.msra.mxu1 %v2342_v38  ;;  %1685 = vmatprep.subr.bf16.mxu0 %v2344_v39 }
  0x54   : > { %1717 = vmatprep.subr.bf16.mxu1 %v2356_v45 }
  0x56   : > { %1687 = vmatpush1.bf16.msra.mxu0 %v2377_v52 }
  0x57   : > { %1719 = vmatpush1.bf16.msra.mxu1 %v2382_v54  ;;  %1689 = vmatprep.subr.bf16.mxu0 %v2384_v57 }
  0x58   : > { %1721 = vmatprep.subr.bf16.mxu1 %v2393_v61 }
  0x5a   : > { %1691 = vmatpush1.bf16.msra.mxu0 %v2402_v0 }
  0x5b   : > { %1723 = vmatpush1.bf16.msra.mxu1 %v2406_v1  ;;  %1725 = vmatprep.subr.bf16.mxu0 %v2115_v19 }
  0x5c   : > { %1757 = vmatprep.subr.bf16.mxu1 %v2117_v20 }
 0x110   : > { %v760_v15 = vpop.f32.mrb[0].mxu0 }
 0x111   : > { %v1852_v22 = vadd.f32 %v760_v15, %v2450_v13  ;;  %v831_v23 = vpop.f32.mrb[0].mxu1  ;;  %v762_v25 = vpop.f32.mrb[1].mxu0 }
 0x112   : > { %v1853_v27 = vadd.f32 %v762_v25, %v2452_v14  ;;  %v833_v29 = vpop.f32.mrb[1].mxu1  ;;  %v1860_v47 = vadd.f32 %v831_v23, %v2459_v43 }
 0x113   : > { %v1569_v30 = vmul.f32 -1.442695, %v1852_v22  ;;  %v1861_v40 = vadd.f32 %v833_v29, %v2456_v34 }
 0x114   : > { %v1570_v31 = vmul.f32 -1.442695, %v1853_v27 }
 0x115   : > { %1909 = vpow2.f32 %v1569_v30  ;;  %v1571_v44 = vmul.f32 -1.442695, %v1861_v40 }
 0x116   : > { %1911 = vpow2.f32 %v1570_v31 }
 0x117   : > { %1913 = vpow2.f32 %v1571_v44 }
 0x118   : > { %1915 = vtanh.f32 %v1860_v47 }
 0x11f   : > { %v1910_v48 = vpop.eup %1909 }
 0x120   : > { %v1912_v49 = vpop.eup %1911  ;;  %v843_v50 = vadd.f32 1.0, %v1910_v48 }
 0x121   : > { %v849_v51 = vadd.f32 1.0, %v1912_v49  ;;  %v1914_v58 = vpop.eup %1913 }
 0x122   : > { %1917 = vrcp.f32 %v843_v50  ;;  %v1916_v59 = vpop.eup %1915  ;;  %v856_v7 = vadd.f32 1.0, %v1914_v58 }
 0x123   : > { %1919 = vrcp.f32 %v849_v51 }
 0x124   : > { %1921 = vrcp.f32 %v856_v7 }
 0x12c   : > { %v1918_v63 = vpop.eup %1917 }
 0x12d   : > { %v1920_v3 = vpop.eup %1919  ;;  %v860_v6 = vmul.f32 %v1918_v63, %v1916_v59 }
 0x12e   : > { %v859_v8 = vmul.f32 %v1920_v3, %v693_v62  ;;  %v1922_v12 = vpop.eup %1921 }
 0x130   : > { %v2462_v11 = vadd.f32 %v860_v6, %v859_v8 }
 0x132   : > { %1923 = vtanh.f32 %v2462_v11 }
 0x13c   : > { %v1924_v15 = vpop.eup %1923 }
 0x13d   : > { %v863_v16 = vmul.f32 %v1924_v15, %v1922_v12 }
 0x13f   : > { %864 = vst [vmem:[%s2069_s16] sm:$0xff] %v863_v16  ;;  %930 = vmatmul.mubr.f32.vlgmr.msra.gmra.mrb[2].mxu0 %v863_v16  ;;  %1001 = vmatmul.mubr.f32.vlgmr.msra.gmra.mrb[2].mxu1 %v863_v16 }
 0x140   : > { %1727 = vmatpush1.bf16.msra.mxu0 %v2126_v24  ;;  %1759 = vmatpush1.bf16.msra.mxu1 %v2139_v28 }
 0x141   : > { %1729 = vmatprep.subr.bf16.mxu0 %v2151_v32  ;;  %1761 = vmatprep.subr.bf16.mxu1 %v2153_v33 }
 0x142   : > { %1101 = vmatprep.mubr.f32.mxu0 %v1997_v9  ;;  %1172 = vmatprep.mubr.f32.mxu1 %v1997_v9 }
 0x144   : > { %1731 = vmatpush1.bf16.msra.mxu0 %v2166_v37  ;;  %1763 = vmatpush1.bf16.msra.mxu1 %v2179_v41 }
 0x145   : > { %1733 = vmatprep.subr.bf16.mxu0 %v2181_v42  ;;  %1765 = vmatprep.subr.bf16.mxu1 %v2193_v46 }
 0x148   : > { %1735 = vmatpush1.bf16.msra.mxu0 %v2216_v53  ;;  %1767 = vmatpush1.bf16.msra.mxu1 %v2223_v55 }
 0x149   : > { %1737 = vmatprep.subr.bf16.mxu0 %v2225_v56  ;;  %1769 = vmatprep.subr.bf16.mxu1 %v2237_v60 }
 0x14c   : > { %1739 = vmatpush1.bf16.msra.mxu0 %v2255_v2  ;;  %1771 = vmatpush1.bf16.msra.mxu1 %v2260_v4 }
 0x14d   : > { %1741 = vmatprep.subr.bf16.mxu0 %v2262_v5  ;;  %1773 = vmatprep.subr.bf16.mxu1 %v2274_v10 }
 0x150   : > { %1743 = vmatpush1.bf16.msra.mxu0 %v2296_v17  ;;  %1775 = vmatpush1.bf16.msra.mxu1 %v2301_v18 }
 0x151   : > { %1745 = vmatprep.subr.bf16.mxu0 %v2303_v21  ;;  %1777 = vmatprep.subr.bf16.mxu1 %v2315_v26 }
 0x154   : > { %1747 = vmatpush1.bf16.msra.mxu0 %v2337_v36  ;;  %1779 = vmatpush1.bf16.msra.mxu1 %v2342_v38 }
 0x155   : > { %1749 = vmatprep.subr.bf16.mxu0 %v2344_v39  ;;  %1781 = vmatprep.subr.bf16.mxu1 %v2356_v45 }
 0x158   : > { %1751 = vmatpush1.bf16.msra.mxu0 %v2377_v52  ;;  %1783 = vmatpush1.bf16.msra.mxu1 %v2382_v54 }
 0x159   : > { %1753 = vmatprep.subr.bf16.mxu0 %v2384_v57  ;;  %1785 = vmatprep.subr.bf16.mxu1 %v2393_v61 }
 0x15c   : > { %1755 = vmatpush1.bf16.msra.mxu0 %v2402_v0  ;;  %1787 = vmatpush1.bf16.msra.mxu1 %v2406_v1 }
 0x15d   : > { %1789 = vmatprep.subr.bf16.mxu0 %v2115_v19  ;;  %1821 = vmatprep.subr.bf16.mxu1 %v2117_v20 }
 0x212   : > { %v931_v22 = vpop.f32.mrb[2].mxu0  ;;  %v1002_v23 = vpop.f32.mrb[2].mxu1 }
 0x213   : > { %v1854_v25 = vadd.f32 %v931_v22, %v2450_v13  ;;  %v933_v27 = vpop.f32.mrb[3].mxu0  ;;  %v1004_v29 = vpop.f32.mrb[3].mxu1  ;;  %v1862_v47 = vadd.f32 %v1002_v23, %v2459_v43 }
 0x214   : > { %v1855_v30 = vadd.f32 %v933_v27, %v2452_v14  ;;  %v1863_v40 = vadd.f32 %v1004_v29, %v2456_v34 }
 0x215   : > { %v1572_v31 = vmul.f32 -1.442695, %v1854_v25 }
 0x216   : > { %v1573_v35 = vmul.f32 -1.442695, %v1855_v30  ;;  %v1574_v44 = vmul.f32 -1.442695, %v1863_v40 }
 0x217   : > { %1925 = vpow2.f32 %v1572_v31 }
 0x218   : > { %1927 = vpow2.f32 %v1573_v35 }
 0x219   : > { %1929 = vpow2.f32 %v1574_v44 }
 0x21a   : > { %1931 = vtanh.f32 %v1862_v47 }
 0x221   : > { %v1926_v19 = vpop.eup %1925 }
 0x222   : > { %v1928_v48 = vpop.eup %1927  ;;  %v1014_v20 = vadd.f32 1.0, %v1926_v19 }
 0x223   : > { %v1020_v49 = vadd.f32 1.0, %v1928_v48  ;;  %v1930_v50 = vpop.eup %1929 }
 0x224   : > { %1933 = vrcp.f32 %v1014_v20  ;;  %v1932_v51 = vpop.eup %1931  ;;  %v1027_v63 = vadd.f32 1.0, %v1930_v50 }
 0x225   : > { %1935 = vrcp.f32 %v1020_v49 }
 0x226   : > { %1937 = vrcp.f32 %v1027_v63 }
 0x22e   : > { %v1934_v58 = vpop.eup %1933 }
 0x22f   : > { %v1936_v59 = vpop.eup %1935  ;;  %v1031_v62 = vmul.f32 %v1934_v58, %v1932_v51 }
 0x230   : > { %v1030_v3 = vmul.f32 %v1936_v59, %v2462_v11  ;;  %v1938_v7 = vpop.eup %1937 }
 0x232   : > { %v2505_v6 = vadd.f32 %v1031_v62, %v1030_v3 }
 0x234   : > { %1939 = vtanh.f32 %v2505_v6 }
 0x23e   : > { %v1940_v8 = vpop.eup %1939 }
 0x23f   : > { %v1034_v12 = vmul.f32 %v1940_v8, %v1938_v7 }
 0x241   : > { %1575 = vst [vmem:[%s2069_s16 + $0x8] sm:$0xff] %v1034_v12  ;;  %1102 = vmatmul.mubr.f32.vlgmr.msra.gmra.mrb[4].mxu0 %v1034_v12  ;;  %1173 = vmatmul.mubr.f32.vlgmr.msra.gmra.mrb[4].mxu1 %v1034_v12 }
 0x242   : > { %1791 = vmatpush1.bf16.msra.mxu0 %v2126_v24  ;;  %1823 = vmatpush1.bf16.msra.mxu1 %v2139_v28 }
 0x243   : > { %1793 = vmatprep.subr.bf16.mxu0 %v2151_v32  ;;  %1825 = vmatprep.subr.bf16.mxu1 %v2153_v33 }
 0x244   : > { %1273 = vmatprep.mubr.f32.mxu0 %v1997_v9  ;;  %1344 = vmatprep.mubr.f32.mxu1 %v1997_v9 }
 0x246   : > { %1795 = vmatpush1.bf16.msra.mxu0 %v2166_v37  ;;  %1827 = vmatpush1.bf16.msra.mxu1 %v2179_v41 }
 0x247   : > { %1797 = vmatprep.subr.bf16.mxu0 %v2181_v42  ;;  %1829 = vmatprep.subr.bf16.mxu1 %v2193_v46 }
 0x24a   : > { %1799 = vmatpush1.bf16.msra.mxu0 %v2216_v53  ;;  %1831 = vmatpush1.bf16.msra.mxu1 %v2223_v55 }
 0x24b   : > { %1801 = vmatprep.subr.bf16.mxu0 %v2225_v56  ;;  %1833 = vmatprep.subr.bf16.mxu1 %v2237_v60 }
 0x24e   : > { %1803 = vmatpush1.bf16.msra.mxu0 %v2255_v2  ;;  %1835 = vmatpush1.bf16.msra.mxu1 %v2260_v4 }
 0x24f   : > { %1805 = vmatprep.subr.bf16.mxu0 %v2262_v5  ;;  %1837 = vmatprep.subr.bf16.mxu1 %v2274_v10 }
 0x252   : > { %1807 = vmatpush1.bf16.msra.mxu0 %v2296_v17  ;;  %1839 = vmatpush1.bf16.msra.mxu1 %v2301_v18 }
 0x253   : > { %1809 = vmatprep.subr.bf16.mxu0 %v2303_v21  ;;  %1841 = vmatprep.subr.bf16.mxu1 %v2315_v26 }
 0x256   : > { %1811 = vmatpush1.bf16.msra.mxu0 %v2337_v36  ;;  %1843 = vmatpush1.bf16.msra.mxu1 %v2342_v38 }
 0x257   : > { %1813 = vmatprep.subr.bf16.mxu0 %v2344_v39  ;;  %1845 = vmatprep.subr.bf16.mxu1 %v2356_v45 }
 0x25a   : > { %1815 = vmatpush1.bf16.msra.mxu0 %v2377_v52  ;;  %1847 = vmatpush1.bf16.msra.mxu1 %v2382_v54 }
 0x25b   : > { %1817 = vmatprep.subr.bf16.mxu0 %v2384_v57  ;;  %1849 = vmatprep.subr.bf16.mxu1 %v2393_v61 }
 0x25e   : > { %1819 = vmatpush1.bf16.msra.mxu0 %v2402_v0  ;;  %1851 = vmatpush1.bf16.msra.mxu1 %v2406_v1 }
 0x314   : > { %v1103_v9 = vpop.f32.mrb[4].mxu0  ;;  %v1174_v24 = vpop.f32.mrb[4].mxu1 }
 0x315   : > { %v1856_v28 = vadd.f32 %v1103_v9, %v2450_v13  ;;  %v1105_v32 = vpop.f32.mrb[5].mxu0  ;;  %v1176_v33 = vpop.f32.mrb[5].mxu1  ;;  %v1864_v55 = vadd.f32 %v1174_v24, %v2459_v43 }
 0x316   : > { %v1857_v37 = vadd.f32 %v1105_v32, %v2452_v14  ;;  %v1865_v46 = vadd.f32 %v1176_v33, %v2456_v34 }
 0x317   : > { %v1576_v41 = vmul.f32 -1.442695, %v1856_v28 }
 0x318   : > { %v1577_v42 = vmul.f32 -1.442695, %v1857_v37  ;;  %v1578_v53 = vmul.f32 -1.442695, %v1865_v46 }
 0x319   : > { %1941 = vpow2.f32 %v1576_v41 }
 0x31a   : > { %1943 = vpow2.f32 %v1577_v42 }
 0x31b   : > { %1945 = vpow2.f32 %v1578_v53 }
 0x31c   : > { %1947 = vtanh.f32 %v1864_v55 }
 0x323   : > { %v1942_v56 = vpop.eup %1941 }
 0x324   : > { %v1944_v60 = vpop.eup %1943  ;;  %v1186_v2 = vadd.f32 1.0, %v1942_v56 }
 0x325   : > { %v1192_v4 = vadd.f32 1.0, %v1944_v60  ;;  %v1946_v5 = vpop.eup %1945 }
 0x326   : > { %1949 = vrcp.f32 %v1186_v2  ;;  %v1948_v10 = vpop.eup %1947  ;;  %v1199_v26 = vadd.f32 1.0, %v1946_v5 }
 0x327   : > { %1951 = vrcp.f32 %v1192_v4 }
 0x328   : > { %1953 = vrcp.f32 %v1199_v26 }
 0x330   : > { %v1950_v17 = vpop.eup %1949 }
 0x331   : > { %v1952_v18 = vpop.eup %1951  ;;  %v1203_v21 = vmul.f32 %v1950_v17, %v1948_v10 }
 0x332   : > { %v1202_v36 = vmul.f32 %v1952_v18, %v2505_v6  ;;  %v1954_v39 = vpop.eup %1953 }
 0x334   : > { %v1204_v38 = vadd.f32 %v1203_v21, %v1202_v36 }
 0x336   : > { %1955 = vtanh.f32 %v1204_v38 }
 0x340   : > { %v1956_v45 = vpop.eup %1955 }
 0x341   : > { %v1206_v52 = vmul.f32 %v1956_v45, %v1954_v39 }
 0x343   : > { %1579 = vst [vmem:[%s2069_s16 + $0x10] sm:$0xff] %v1206_v52  ;;  %1274 = vmatmul.mubr.f32.vlgmr.msra.gmra.mrb[6].mxu0 %v1206_v52  ;;  %1345 = vmatmul.mubr.f32.vlgmr.msra.gmra.mrb[6].mxu1 %v1206_v52 }
 0x416   : > { %v1275_v54 = vpop.f32.mrb[6].mxu0  ;;  %v1346_v57 = vpop.f32.mrb[6].mxu1 }
 0x417   : > { %v1858_v61 = vadd.f32 %v1275_v54, %v2450_v13  ;;  %v1277_v0 = vpop.f32.mrb[7].mxu0  ;;  %v1348_v1 = vpop.f32.mrb[7].mxu1  ;;  %v1866_v25 = vadd.f32 %v1346_v57, %v2459_v43 }
 0x418   : > { %v1859_v11 = vadd.f32 %v1277_v0, %v2452_v14  ;;  %v1867_v22 = vadd.f32 %v1348_v1, %v2456_v34 }
 0x419   : > { %v1580_v15 = vmul.f32 -1.442695, %v1858_v61 }
 0x41a   : > { %v1581_v16 = vmul.f32 -1.442695, %v1859_v11  ;;  %v1582_v23 = vmul.f32 -1.442695, %v1867_v22 }
 0x41b   : > { %1957 = vpow2.f32 %v1580_v15 }
 0x41c   : > { %1959 = vpow2.f32 %v1581_v16 }
 0x41d   : > { %1961 = vpow2.f32 %v1582_v23 }
 0x41e   : > { %1963 = vtanh.f32 %v1866_v25 }
 0x425   : > { %v1958_v27 = vpop.eup %1957 }
 0x426   : > { %v1960_v29 = vpop.eup %1959  ;;  %v1358_v30 = vadd.f32 1.0, %v1958_v27 }
 0x427   : > { %v1364_v31 = vadd.f32 1.0, %v1960_v29  ;;  %v1962_v13 = vpop.eup %1961 }
 0x428   : > { %1965 = vrcp.f32 %v1358_v30  ;;  %v1964_v14 = vpop.eup %1963  ;;  %v1371_v47 = vadd.f32 1.0, %v1962_v13 }
 0x429   : > { %1967 = vrcp.f32 %v1364_v31 }
 0x42a   : > { %1969 = vrcp.f32 %v1371_v47 }
 0x432   : > { %v1966_v35 = vpop.eup %1965 }
 0x433   : > { %v1968_v40 = vpop.eup %1967  ;;  %v1375_v44 = vmul.f32 %v1966_v35, %v1964_v14 }
 0x434   : > { %v1374_v19 = vmul.f32 %v1968_v40, %v1204_v38  ;;  %v1970_v43 = vpop.eup %1969 }
 0x436   : > { %v1376_v34 = vadd.f32 %v1375_v44, %v1374_v19 }
 0x438   : > { %1971 = vtanh.f32 %v1376_v34  ;;  %1382 = vst [vmem:[#allocation3] sm:$0xff] %v1376_v34  ;;  %1384 = vst [vmem:[%s2575_s8] sm:$0xff] %v1376_v34 }
 0x442   : > { %v1972_v48 = vpop.eup %1971 }
 0x443   : > { %v1378_v20 = vmul.f32 %v1972_v48, %v1970_v43 }
 0x445   : > { %1583 = vst [vmem:[%s2069_s16 + $0x18] sm:$0xff] %v1378_v20  ;;  %1381 = vst [vmem:[#allocation2] sm:$0xff] %v1378_v20 }
 0x446   : > { %1383 = vst [vmem:[%s2574_s7] sm:$0xff] %v1378_v20 }
 0x447 PF: > { %s19_s29 = sadd.s32 1, %s1995_s29   ;;  %s2576_s27 = smov %s1991_s28 }
 0x448   : > { %p16_p6 = scmp.ge.s32.totalorder %s19_s29, 4   ;;  %s2577_s28 = smov %s2579_s30 }
 0x44a   :  { %18 = sbr.rel (!%p16_p6) target bundleno = 2 (0x2), region = 111 }

</bundles_post_ra>
